<compile_context>
chip_gen: v7x
topology: tpu7x:2x2x1
jax: 0.10.0
libtpu: 0.0.40
codegen_flags: <defaults>
</compile_context>

<pallas_src>
import functools

import jax
import jax.numpy as jnp
import numpy as np
from jax.experimental import pallas as pl
from jax.experimental.pallas import tpu as pltpu

LANE = 128
_EPS = 1e-5
_SLOPE = 0.01


def _rup(n, m):
    return ((n + m - 1) // m) * m


def _leaky(h, slope):
    return jnp.where(h > 0, h, slope * h)


# ---------------------------------------------------------------------------
# Kernels (each is row-tiled over the flattened N*L axis)
# ---------------------------------------------------------------------------

def _matmul_stats_kernel(x_ref, w_ref, y_ref, sum_ref, ssq_ref):
    """Pass 1: y = x @ [w1 | wid] (fused conv1 + identity proj) + partial stats."""
    y = jnp.dot(x_ref[...], w_ref[...], preferred_element_type=jnp.float32)
    y_ref[...] = y
    sum_ref[0] = jnp.sum(y, axis=0, keepdims=True)
    ssq_ref[0] = jnp.sum(y * y, axis=0, keepdims=True)


def _bn_conv3_stats_kernel(h_ref, sc_ref, sh_ref, w_ref, y_ref, sum_ref, ssq_ref,
                           *, L, slope):
    """Pass 2: bn1 (scale/shift) -> leaky -> conv k=3 pad=1 (one matmul) + stats."""
    h = _leaky(h_ref[...] * sc_ref[...] + sh_ref[...], slope)
    tm, c = h.shape
    zrow = jnp.zeros((1, c), h.dtype)
    left = jnp.concatenate([zrow, h[:tm - 1, :]], axis=0)    # h[l-1]
    right = jnp.concatenate([h[1:, :], zrow], axis=0)        # h[l+1]
    # (TM, 1) in-sample position mask. Tiles are aligned to sample boundaries,
    # so zeroing the l==0 / l==L-1 rows also removes cross-sample contamination.
    pos = jax.lax.broadcasted_iota(jnp.int32, (tm, 1), 0) % L
    left = jnp.where(pos == 0, 0.0, left)
    right = jnp.where(pos == L - 1, 0.0, right)
    hin = jnp.concatenate([left, h, right], axis=1)          # (TM, 3*Cmid)
    y = jnp.dot(hin, w_ref[...], preferred_element_type=jnp.float32)
    y_ref[...] = y
    sum_ref[0] = jnp.sum(y, axis=0, keepdims=True)
    ssq_ref[0] = jnp.sum(y * y, axis=0, keepdims=True)


def _bn_matmul_stats_kernel(h_ref, sc_ref, sh_ref, w_ref, y_ref, sum_ref, ssq_ref,
                            *, slope):
    """Pass 3: bn2 (scale/shift) -> leaky -> conv3 (1x1 expand) + stats."""
    h = _leaky(h_ref[...] * sc_ref[...] + sh_ref[...], slope)
    y = jnp.dot(h, w_ref[...], preferred_element_type=jnp.float32)
    y_ref[...] = y
    sum_ref[0] = jnp.sum(y, axis=0, keepdims=True)
    ssq_ref[0] = jnp.sum(y * y, axis=0, keepdims=True)


def _residual_kernel(h3_ref, idn_ref, sc3_ref, sh3_ref, scid_ref, shid_ref, o_ref,
                     *, slope):
    """Pass 4: leaky(bn3(h3)) + bn_id(idn), then final leaky."""
    h3 = _leaky(h3_ref[...] * sc3_ref[...] + sh3_ref[...], slope)
    idn = idn_ref[...] * scid_ref[...] + shid_ref[...]
    o_ref[...] = _leaky(h3 + idn, slope)


# ---------------------------------------------------------------------------
# Plain-JAX glue (tiny per-channel vectors only; no slab arithmetic here)
# ---------------------------------------------------------------------------

def _scale_shift(part_sum, part_ssq, gamma, beta, count, eps):
    s = jnp.sum(part_sum, axis=0)                         # (1, C)
    q = jnp.sum(part_ssq, axis=0)                         # (1, C)
    mean = s / count
    var = jnp.maximum(q / count - mean * mean, 0.0)       # clamp f32 cancellation
    scale = gamma * jax.lax.rsqrt(var + eps)
    shift = beta - mean * scale
    return scale, shift


def _pad_cols(v, c):
    return jnp.pad(v, ((0, 0), (0, c - v.shape[1])))


def _choose_samples_per_tile(N, L, bytes_per_row, max_tile_rows, budget_bytes):
    """Largest whole-sample, 8-row-aligned tile under the per-tile VMEM budget."""
    max_rows = max(L, min(max_tile_rows, budget_bytes // max(1, bytes_per_row)))
    best = None
    for spt in range(1, N + 1):
        if N % spt:
            continue
        rows = spt * L
        if rows > max_rows:
            break
        if rows % 8 == 0:
            best = spt
    return best if best is not None else N   # full-slab fallback (always legal)


# ---------------------------------------------------------------------------
# Forward
# ---------------------------------------------------------------------------

def bottleneck_forward(x_ncl, p, *, stride=1, max_tile_rows=512):
    # TODO(synk): stride > 1 (strided conv2 + strided identity conv) not implemented.
    assert stride == 1
    N, Cin, L = x_ncl.shape
    Cmid = p["w1"].shape[1]
    Cout4 = p["w3"].shape[1]
    NL = N * L
    eps, slope = _EPS, _SLOPE

    # Lane-dense channel padding (all zero channels; sliced off at the end).
    CinP, CmidP, Cout4P = _rup(Cin, LANE), _rup(Cmid, LANE), _rup(Cout4, LANE)
    C1P = CmidP + Cout4P

    # -------- wrapper-side layout plumbing --------------------------------------
    x2d = jnp.transpose(x_ncl, (0, 2, 1)).reshape(NL, Cin)
    x2d = jnp.pad(x2d, ((0, 0), (0, CinP - Cin)))

    w1id = jnp.concatenate(
        [jnp.pad(p["w1"], ((0, CinP - Cin), (0, CmidP - Cmid))),
         jnp.pad(p["wid"], ((0, CinP - Cin), (0, Cout4P - Cout4)))], axis=1)
    w2cat = jnp.pad(p["w2"], ((0, 0), (0, CmidP - Cmid), (0, CmidP - Cmid)))
    w2cat = w2cat.reshape(3 * CmidP, CmidP)                # [w2_left; w2_center; w2_right]
    w3p = jnp.pad(p["w3"], ((0, CmidP - Cmid), (0, Cout4P - Cout4)))
    # NOTE: conv biases b1/b2/b3/bid are intentionally dropped — a per-channel
    # constant added before train-mode BN is cancelled exactly by the mean subtraction.

    g1id = jnp.concatenate([_pad_cols(p["g1"], CmidP), _pad_cols(p["gid"], Cout4P)], axis=1)
    be1id = jnp.concatenate([_pad_cols(p["be1"], CmidP), _pad_cols(p["beid"], Cout4P)], axis=1)
    g2, be2 = _pad_cols(p["g2"], CmidP), _pad_cols(p["be2"], CmidP)
    g3, be3 = _pad_cols(p["g3"], Cout4P), _pad_cols(p["be3"], Cout4P)

    # -------- tiling -------------------------------------------------------------
    bytes_per_row = 4 * (CinP + 6 * CmidP + 3 * Cout4P)    # rough f32 live set per row
    spt = _choose_samples_per_tile(N, L, bytes_per_row, max_tile_rows,
                                   budget_bytes=4 * 1024 * 1024)
    TM = spt * L
    num_tiles = NL // TM

    cparams = pltpu.CompilerParams(
        dimension_semantics=("parallel",),        # megacore sharding on v7x
        vmem_limit_bytes=32 * 1024 * 1024,        # explicit: > v5e 16 MiB default,
    )                                             # safely under v7x 64 MiB physical

    row_spec = lambda c: pl.BlockSpec((TM, c), lambda i: (i, 0))
    vec_spec = lambda c: pl.BlockSpec((1, c), lambda i: (0, 0))
    full_spec = lambda r, c: pl.BlockSpec((r, c), lambda i: (0, 0))
    stat_spec = lambda c: pl.BlockSpec((1, 1, c), lambda i: (i, 0, 0))
    stat_shape = lambda c: jax.ShapeDtypeStruct((num_tiles, 1, c), jnp.float32)
    slab_shape = lambda c: jax.ShapeDtypeStruct((NL, c), jnp.float32)

    # ---- pass 1: fused conv1 + identity projection, bn1/bn_id partial stats ----
    y1, s1, q1 = pl.pallas_call(
        _matmul_stats_kernel,
        grid=(num_tiles,),
        in_specs=[row_spec(CinP), full_spec(CinP, C1P)],
        out_specs=[row_spec(C1P), stat_spec(C1P), stat_spec(C1P)],
        out_shape=[slab_shape(C1P), stat_shape(C1P), stat_shape(C1P)],
        compiler_params=cparams,
    )(x2d, w1id)
    sc1id, sh1id = _scale_shift(s1, q1, g1id, be1id, NL, eps)
    sc1, sh1 = sc1id[:, :CmidP], sh1id[:, :CmidP]
    scid, shid = sc1id[:, CmidP:], sh1id[:, CmidP:]
    h1_pre, idn_pre = y1[:, :CmidP], y1[:, CmidP:]

    # ---- pass 2: bn1 -> leaky -> conv2 (k=3, pad=1) as one K=3*Cmid matmul ------
    h2_pre, s2, q2 = pl.pallas_call(
        functools.partial(_bn_conv3_stats_kernel, L=L, slope=slope),
        grid=(num_tiles,),
        in_specs=[row_spec(CmidP), vec_spec(CmidP), vec_spec(CmidP),
                  full_spec(3 * CmidP, CmidP)],
        out_specs=[row_spec(CmidP), stat_spec(CmidP), stat_spec(CmidP)],
        out_shape=[slab_shape(CmidP), stat_shape(CmidP), stat_shape(CmidP)],
        compiler_params=cparams,
    )(h1_pre, sc1, sh1, w2cat)
    sc2, sh2 = _scale_shift(s2, q2, g2, be2, NL, eps)

    # ---- pass 3: bn2 -> leaky -> conv3 (1x1, expand 4x) -------------------------
    h3_pre, s3, q3 = pl.pallas_call(
        functools.partial(_bn_matmul_stats_kernel, slope=slope),
        grid=(num_tiles,),
        in_specs=[row_spec(CmidP), vec_spec(CmidP), vec_spec(CmidP),
                  full_spec(CmidP, Cout4P)],
        out_specs=[row_spec(Cout4P), stat_spec(Cout4P), stat_spec(Cout4P)],
        out_shape=[slab_shape(Cout4P), stat_shape(Cout4P), stat_shape(Cout4P)],
        compiler_params=cparams,
    )(h2_pre, sc2, sh2, w3p)
    sc3, sh3 = _scale_shift(s3, q3, g3, be3, NL, eps)

    # ---- pass 4: leaky(bn3(h3)) + bn_id(idn) -> final leaky ---------------------
    out2d = pl.pallas_call(
        functools.partial(_residual_kernel, slope=slope),
        grid=(num_tiles,),
        in_specs=[row_spec(Cout4P), row_spec(Cout4P)] + [vec_spec(Cout4P)] * 4,
        out_specs=row_spec(Cout4P),
        out_shape=slab_shape(Cout4P),
        compiler_params=cparams,
    )(h3_pre, idn_pre, sc3, sh3, scid, shid)

    out2d = out2d[:, :Cout4]
    return jnp.transpose(out2d.reshape(N, L, Cout4), (0, 2, 1))   # back to NCL


# ---------------------------------------------------------------------------
# Pure-JAX reference (mirrors PyTorch train-mode forward) and param init
# ---------------------------------------------------------------------------

def reference(x_ncl, p, eps=_EPS, slope=_SLOPE):
    x = jnp.transpose(x_ncl, (0, 2, 1))  # (N, L, C)
    L = x.shape[1]

    def bn(h, g, b):
        m = jnp.mean(h, axis=(0, 1), keepdims=True)
        v = jnp.mean((h - m) ** 2, axis=(0, 1), keepdims=True)
        return (h - m) / jnp.sqrt(v + eps) * g.reshape(1, 1, -1) + b.reshape(1, 1, -1)

    def lr(h):
        return jnp.where(h > 0, h, slope * h)

    h1 = lr(bn(x @ p["w1"] + p["b1"].reshape(1, 1, -1), p["g1"], p["be1"]))
    hp = jnp.pad(h1, ((0, 0), (1, 1), (0, 0)))
    h2 = (hp[:, 0:L] @ p["w2"][0] + hp[:, 1:L + 1] @ p["w2"][1]
          + hp[:, 2:L + 2] @ p["w2"][2] + p["b2"].reshape(1, 1, -1))
    h2 = lr(bn(h2, p["g2"], p["be2"]))
    h3 = lr(bn(h2 @ p["w3"] + p["b3"].reshape(1, 1, -1), p["g3"], p["be3"]))
    idn = bn(x @ p["wid"] + p["bid"].reshape(1, 1, -1), p["gid"], p["beid"])
    return jnp.transpose(lr(h3 + idn), (0, 2, 1))


def init_params(key, in_channels, out_channels):
    c4 = out_channels * 4
    ks = jax.random.split(key, 17)
    f32 = jnp.float32

    def w(k, shape, scale=0.2):
        return (scale * jax.random.normal(k, shape)).astype(f32)

    return {
        "w1": w(ks[0], (in_channels, out_channels)),
        "b1": w(ks[1], (1, out_channels)),
        "g1": 1.0 + w(ks[2], (1, out_channels), 0.05),
        "be1": w(ks[3], (1, out_channels), 0.05),
        "w2": w(ks[4], (3, out_channels, out_channels)),
        "b2": w(ks[5], (1, out_channels)),
        "g2": 1.0 + w(ks[6], (1, out_channels), 0.05),
        "be2": w(ks[7], (1, out_channels), 0.05),
        "w3": w(ks[8], (out_channels, c4)),
        "b3": w(ks[9], (1, c4)),
        "g3": 1.0 + w(ks[10], (1, c4), 0.05),
        "be3": w(ks[11], (1, c4), 0.05),
        "wid": w(ks[12], (in_channels, c4)),
        "bid": w(ks[13], (1, c4)),
        "gid": 1.0 + w(ks[14], (1, c4), 0.05),
        "beid": w(ks[15], (1, c4), 0.05),
    }


if __name__ == "__main__":
    key = jax.random.PRNGKey(0)
    k_x, k_p = jax.random.split(key)

    N, Cin, Cout, L = 2, 4, 4, 16          # input NCL = (2, 4, 16), output = (2, 16, 16)
    x = jax.random.normal(k_x, (N, Cin, L), dtype=jnp.float32)
    params = init_params(k_p, Cin, Cout)

    # Cap tile rows at L so the toy problem still exercises the multi-tile grid path.
    out = bottleneck_forward(x, params, stride=1, max_tile_rows=L)
    out = jax.block_until_ready(out)

    ref = jax.block_until_ready(reference(x, params))
    assert out.shape == (N, Cout * 4, L), out.shape
    np.testing.assert_allclose(np.asarray(out), np.asarray(ref), atol=5e-4, rtol=5e-4)

    print("KERNEL_OK")
</pallas_src>

<mosaic_0001>
module attributes {stable_mosaic.version = 11 : i64} {
  func.func @_matmul_stats_kernel(%arg0: i32, %arg1: memref<16x128xf32, #tpu.memory_space<vmem>>, %arg2: memref<128x256xf32, #tpu.memory_space<vmem>>, %arg3: memref<16x256xf32, #tpu.memory_space<vmem>>, %arg4: memref<1x1x256xf32, #tpu.memory_space<vmem>>, %arg5: memref<1x1x256xf32, #tpu.memory_space<vmem>>) attributes {dimension_semantics = [#tpu.dimension_semantics<parallel>], iteration_bounds = array<i64: 2>, scalar_prefetch = 0 : i64, scratch_operands = 0 : i64, tpu.core_type = #tpu.core_type<tc>, window_params = [{transform_indices = @transform_0, window_bounds = array<i64: 16, 128>}, {pipeline_mode = #tpu.pipeline_mode<synchronous>, transform_indices = @transform_1, window_bounds = array<i64: 128, 256>}, {transform_indices = @transform_2, window_bounds = array<i64: 16, 256>}, {transform_indices = @transform_3, window_bounds = array<i64: 1, 1, 256>}, {transform_indices = @transform_4, window_bounds = array<i64: 1, 1, 256>}]} {
    %c0 = arith.constant 0 : index
    %c0_0 = arith.constant 0 : index
    %0 = vector.load %arg1[%c0, %c0_0] : memref<16x128xf32, #tpu.memory_space<vmem>>, vector<16x128xf32>
    %c0_1 = arith.constant 0 : index
    %c0_2 = arith.constant 0 : index
    %1 = vector.load %arg2[%c0_1, %c0_2] : memref<128x256xf32, #tpu.memory_space<vmem>>, vector<128x256xf32>
    %cst = arith.constant dense<0.000000e+00> : vector<16x256xf32>
    %2 = tpu.matmul %0, %1, %cst {dimension_numbers = #tpu.dot_dimension_numbers<[1], [0], [0], [1], [0, 0, 1, 1], [], []>} : vector<16x128xf32>, vector<128x256xf32>, vector<16x256xf32> -> vector<16x256xf32>
    %c0_3 = arith.constant 0 : index
    %c0_4 = arith.constant 0 : index
    %3 = vector.load %arg3[%c0_3, %c0_4] : memref<16x256xf32, #tpu.memory_space<vmem>>, vector<16x256xf32>
    tpu.vector_store %arg3[%c0_3, %c0_4], %2 {strides = array<i32>} : memref<16x256xf32, #tpu.memory_space<vmem>>, vector<16x256xf32>,
    %cst_5 = arith.constant dense<0.000000e+00> : vector<256xf32>
    %4 = vector.multi_reduction <add>, %2, %cst_5 [0] : vector<16x256xf32> to vector<256xf32>
    %5 = vector.shape_cast %4 : vector<256xf32> to vector<1x256xf32>
    %c0_6 = arith.constant 0 : index
    %c0_7 = arith.constant 0 : index
    %c0_8 = arith.constant 0 : index
    %6 = vector.load %arg4[%c0_6, %c0_7, %c0_8] : memref<1x1x256xf32, #tpu.memory_space<vmem>>, vector<1x1x256xf32>
    %7 = vector.shape_cast %6 : vector<1x1x256xf32> to vector<1x256xf32>
    %8 = vector.shape_cast %5 : vector<1x256xf32> to vector<1x1x256xf32>
    tpu.vector_store %arg4[%c0_6, %c0_7, %c0_8], %8 {strides = array<i32>} : memref<1x1x256xf32, #tpu.memory_space<vmem>>, vector<1x1x256xf32>,
    %9 = arith.mulf %2, %2 : vector<16x256xf32>
    %cst_9 = arith.constant dense<0.000000e+00> : vector<256xf32>
    %10 = vector.multi_reduction <add>, %9, %cst_9 [0] : vector<16x256xf32> to vector<256xf32>
    %11 = vector.shape_cast %10 : vector<256xf32> to vector<1x256xf32>
    %c0_10 = arith.constant 0 : index
    %c0_11 = arith.constant 0 : index
    %c0_12 = arith.constant 0 : index
    %12 = vector.load %arg5[%c0_10, %c0_11, %c0_12] : memref<1x1x256xf32, #tpu.memory_space<vmem>>, vector<1x1x256xf32>
    %13 = vector.shape_cast %12 : vector<1x1x256xf32> to vector<1x256xf32>
    %14 = vector.shape_cast %11 : vector<1x256xf32> to vector<1x1x256xf32>
    tpu.vector_store %arg5[%c0_10, %c0_11, %c0_12], %14 {strides = array<i32>} : memref<1x1x256xf32, #tpu.memory_space<vmem>>, vector<1x1x256xf32>,
    return
  }
  func.func @transform_0(%arg0: i32) -> (i32, i32) {
    %c0_i32 = arith.constant 0 : i32
    %c0_i32_0 = arith.constant 0 : i32
    return %arg0, %c0_i32 : i32, i32
  }
  func.func @transform_1(%arg0: i32) -> (i32, i32) {
    %c0_i32 = arith.constant 0 : i32
    %c0_i32_0 = arith.constant 0 : i32
    %c0_i32_1 = arith.constant 0 : i32
    return %c0_i32, %c0_i32_0 : i32, i32
  }
  func.func @transform_2(%arg0: i32) -> (i32, i32) {
    %c0_i32 = arith.constant 0 : i32
    %c0_i32_0 = arith.constant 0 : i32
    return %arg0, %c0_i32 : i32, i32
  }
  func.func @transform_3(%arg0: i32) -> (i32, i32, i32) {
    %c0_i32 = arith.constant 0 : i32
    %c0_i32_0 = arith.constant 0 : i32
    %c0_i32_1 = arith.constant 0 : i32
    return %arg0, %c0_i32, %c0_i32_0 : i32, i32, i32
  }
  func.func @transform_4(%arg0: i32) -> (i32, i32, i32) {
    %c0_i32 = arith.constant 0 : i32
    %c0_i32_0 = arith.constant 0 : i32
    %c0_i32_1 = arith.constant 0 : i32
    return %arg0, %c0_i32, %c0_i32_0 : i32, i32, i32
  }
}

</mosaic_0001>

<bundles_post_ra>
// kernel: tpu_custom_call.1
= control target key start
LH: loop header
LB: loop body
LE: loop exit
PB: predicated region body
PF: predicated region fallthrough
CT: control target
= control target key end

     0   :  { %10 = vsyncpa [#allocation3], 0  ;;  %s1303_s0 = inlined_call_operand.hbm [shape: f32[32,128], index: 0, kind: input, shape index: {}]   ;;  %s1304_s1 = inlined_call_operand.hbm [shape: f32[128,256], index: 1, kind: input, shape index: {}]   ;;  %s1305_s2 = inlined_call_operand.hbm [shape: f32[32,256], index: 2, kind: output, shape index: {0}]   ;;  %s1306_s3 = inlined_call_operand.hbm [shape: f32[2,1,256], index: 3, kind: output, shape index: {1}]   ;;  %s1307_s4 = inlined_call_operand.hbm [shape: f32[2,1,256], index: 4, kind: output, shape index: {2}]  }
   0x1   :  { %12 = vsyncpa [#allocation3 + $0x1], 0 }
   0x2   :  { %13 = vsyncpa [#allocation6], 0 }
   0x3   :  { %14 = vsyncpa [#allocation4], 0 }
   0x4   :  { %16 = vsyncpa [#allocation4 + $0x1], 0 }
   0x5   :  { %17 = vsyncpa [#allocation9], 0 }
   0x6   :  { %19 = vsyncpa [#allocation9 + $0x1], 0  ;;  %s1018_s15 = smov 0   ;;  %s1020_s16 = smov 0  }
   0x7   :  { %s1022_s17 = smov 0   ;;  %s1024_s18 = smov 0  }
   0x8 LB: > { %s1039_s19 = sadd.s32 4294967295, %s978_s18   ;;  %s637_s20 = sadd.s32 4294967294, %s978_s18   ;;  %s978_s18 = sphi %s1024_s18, %s1329_s18   ;;  %s974_s17 = sphi %s1022_s17, %s1328_s17   ;;  %s970_s16 = sphi %s1020_s16, %s1327_s16   ;;  %s966_s15 = sphi %s1018_s15, %s1326_s15  }
   0x9   : > { %p45_p0 = scmp.ne.s32.totalorder %s970_s16, %s966_s15  ;;  %p1308_p1 = scmp.eq.s32.totalorder %s1039_s19, 0 }
   0xa   : > { %p96_p3 = scmp.eq.s32.totalorder %s637_s20, 1  ;;  %p638_p5 = scmp.ge.s32.totalorder %s978_s18, 1 }
   0xb   : > { %p1050_p4 = por %p1308_p1, %p45_p0  ;;  %p155_p7 = scmp.lt.s32.totalorder %s978_s18, 3 }
   0xc   : > { %p1055_p6 = por %p96_p3, %p45_p0  ;;  %s980_s24 = smov [#allocation5]  }
   0xd   : > { %s1311_s21 = scalar_select %p1050_p4, 1, 0 }
   0xe   : > { %s1312_s22 = scalar_select %p1055_p6, 1, 0 }
   0xf   : > { %p1060_p8 = pnand %p638_p5, %p155_p7  ;;  %s167_s25 = sshll.u32 %s980_s24, 4  ;;  %s1064_s25 = int_to_ptr.vmem [resolvable:$true] %s167_s25 }
  0x10   : > { %s1076_s27 = sadd.s32 1, %s978_s18   ;;  %s32_s28 = sadd.s32 1, %s974_s17 }
  0x11   : > { %s1313_s23 = scalar_select %p1060_p8, 1, 0 }
  0x12   : > { %p727_p9 = pneg %p1060_p8  ;;  %s29_s29 = ssub.s32 %s978_s18, %s1076_s27 }
  0x13   : > { %s790_s6 = scalar_lea.hbm %s1304_s1, 4096 }
  0x14   : > { %p1071_p11 = pnand %p727_p9, %p1308_p1  ;;  %p791_p12 = scmp.ne.s32.totalorder %s1304_s1, %s790_s6 }
  0x15   : > { %p797_p5 = scmp.lt.u32.totalorder %s790_s6, %s1304_s1 }
  0x16   : > { %p792_p13 = pneg %p1071_p11 }
  0x18   : > { %p793_p0 = pnand %p792_p13, %p791_p12 }
  0x1a   : > { %p794_p3 = pneg %p793_p0 }
  0x1c   : > { %p799_p7 = pnand %p797_p5, %p794_p3 }
  0x1e   : > { %802 = shalt.err (!%p799_p7)
}
  0x1f   : > { %s803_s11 = scalar_lea.vmem %s1064_s25, 4096  ;;  %p811_p2 = scmp.lt.s32.totalorder %s1064_s25, %s1064_s25 }
  0x20   : > { %p804_p9 = scmp.ne.s32.totalorder %s1064_s25, %s803_s11  ;;  %p812_p6 = scmp.lt.s32.totalorder %s803_s11, %s803_s11 }
  0x22   : > { %p806_p10 = pnand %p804_p9, %p792_p13  ;;  %p813_p4 = por %p812_p6, %p811_p2 }
  0x24   : > { %p807_p1 = pneg %p806_p10 }
  0x26   : > { %p814_p8 = pnand %p813_p4, %p807_p1 }
  0x28   : > { %817 = shalt.err (!%p814_p8)
}
  0x29   : > { %s981_s12 = smov 256   ;;  %s982_s13 = smov 16  }
  0x2a   : > { %730 = dma.hbm_to_vmem [thread:$0]  (!%p1071_p11), %s1304_s1, 4096, %s1064_s25, [#allocation6], %s981_s12, %s981_s12, %s982_s13  }
  0x2b   : > { %p30_p2 = scmp.eq.s32.totalorder %s29_s29, 0  ;;  %p39_p1 = scmp.ne.s32.totalorder %s974_s17, %s970_s16 }
  0x2c   : > { %p40_p4 = scmp.eq.s32.totalorder %s978_s18, 0  ;;  %p746_p6 = scmp.lt.s32.totalorder %s978_s18, 2 }
  0x2d   : > { %s1107_s30 = scalar_select %p30_p2, %s974_s17, %s32_s28  }
  0x2e   : > { %p41_p8 = por %p40_p4, %p39_p1  ;;  %p1315_p10 = scmp.eq.s32.totalorder %s1039_s19, 1 }
  0x2f   : > { %s181_s6 = sand.u32 1, %s974_s17   ;;  %s662_s7 = sshll.u32 %s978_s18, 8 }
  0x30   : > { %p1111_p12 = por %p1315_p10, %p39_p1  ;;  %s641_s8 = sshll.u32 %s181_s6, 4 }
  0x31   : > { %s1120_s10 = scalar_lea.hbm %s1303_s0, %s662_s7  ;;  %s185_s25 = scalar_lea.vmem [#allocation2], %s641_s8 }
  0x32   : > { %s192_s28 = sshll.u32 %s185_s25, 4  ;;  %p1122_p11 = pnand %p746_p6, %p41_p8  ;;  %s1126_s28 = int_to_ptr.vmem [resolvable:$true] %s192_s28 }
  0x33   : > { %s1128_s11 = scalar_lea.sflag [#allocation3], %s181_s6  ;;  %s818_s12 = scalar_lea.hbm %s1120_s10, 256 }
  0x34   : > { %p819_p13 = scmp.ne.s32.totalorder %s1120_s10, %s818_s12  ;;  %p820_p0 = pneg %p1122_p11 }
  0x35   : > { %s823_s24 = scalar_lea.hbm %s1303_s0, 512  ;;  %p824_p7 = scmp.lt.u32.totalorder %s1120_s10, %s1303_s0 }
  0x36   : > { %p821_p3 = pnand %p820_p0, %p819_p13  ;;  %p825_p9 = scmp.lt.u32.totalorder %s823_s24, %s818_s12 }
  0x37   : > { %p827_p1 = scmp.lt.u32.totalorder %s818_s12, %s1120_s10 }
  0x38   : > { %p822_p5 = pneg %p821_p3  ;;  %p826_p2 = por %p825_p9, %p824_p7 }
  0x3a   : > { %p828_p4 = por %p827_p1, %p826_p2 }
  0x3c   : > { %p829_p6 = pnand %p828_p4, %p822_p5 }
  0x3e   : > { %832 = shalt.err (!%p829_p6)
}
  0x3f   : > { %s833_s6 = scalar_lea.vmem %s1126_s28, 256  ;;  %s983_s26 = smov [#allocation2]  }
  0x40   : > { %p834_p8 = scmp.ne.s32.totalorder %s1126_s28, %s833_s6  ;;  %s838_s9 = sshll.u32 %s983_s26, 4  ;;  %s839_s9 = int_to_ptr.vmem [resolvable:$false] %s838_s9 }
  0x41   : > { %s840_s25 = scalar_lea.vmem %s839_s9, 512  ;;  %p841_p3 = scmp.lt.s32.totalorder %s1126_s28, %s839_s9 }
  0x42   : > { %p836_p10 = pnand %p834_p8, %p820_p0  ;;  %p842_p7 = scmp.lt.s32.totalorder %s840_s25, %s833_s6 }
  0x44   : > { %p837_p13 = pneg %p836_p10  ;;  %p843_p9 = por %p842_p7, %p841_p3 }
  0x46   : > { %p844_p2 = pnand %p843_p9, %p837_p13 }
  0x48   : > { %847 = shalt.err (!%p844_p2)
}
  0x49   : > { %s984_s12 = smov 128   ;;  %s985_s13 = smov 8  }
  0x4a   : > { %734 = dma.hbm_to_vmem [thread:$0]  (!%p1122_p11), %s1120_s10, 256, %s1126_s28, %s1128_s11, %s984_s12, %s984_s12, %s985_s13  }
  0x4b   : > { %p1318_p0 = scmp.ne.s32.totalorder %s1313_s23, 0 }
  0x4c   : > { %s1159_s14 = sand.u32 (!%p1318_p0), 1, %s970_s16   ;;  %p1319_p5 = scmp.ne.s32.totalorder (!%p1318_p0), %s1311_s21, 0 }
  0x4d   : > { %204 = sbr.rel (%p1318_p0) target bundleno = 404 (0x194), region = 28  ;;  %s645_s24 = sshll.u32 (!%p1318_p0), %s1159_s14, 4 }
  0x4e   : > { %s207_s7 = scalar_lea.sflag (!%p1318_p0), [#allocation3], %s1159_s14  ;;  %s1163_s8 = scalar_lea.vmem (!%p1318_p0), [#allocation2], %s645_s24 }
  0x54   : > { %949 = dma.done.wait (%p1319_p5), %s207_s7, 256  }
  0x55   : > { %951 = vsyncadd (%p1319_p5), %s207_s7, 4294967040  ;;  %p1320_p11 = scmp.eq.s32.totalorder %s1039_s19, 0 }
  0x57   : > { %953 = dma.done.wait (%p1320_p11), [#allocation6], 4096   ;;  %p1321_p1 = pmov %p1320_p11 }
  0x58   : > { %v986_v0 = vmov 0.0   ;;  %v254_v1 = vld [vmem:[#allocation5 + $0x8] sm:$0xff]  ;;  %v256_v2 = vld [vmem:[#allocation5 + $0x18] sm:$0xff]  ;;  %v253_v3 = vld [vmem:[#allocation5] sm:$0xff]  ;;  %s647_s21 = sshll.u32 %s1159_s14, 5  ;;  %s664_s28 = sshll.u32 %s1039_s19, 9 }
  0x59   : > { %955 = vsyncadd (%p1321_p1), [#allocation6], 4294963200  ;;  %349 = vmatprep.mubr.f32.mxu0 %v986_v0  ;;  %355 = vmatprep.mubr.f32.mxu1 %v986_v0  ;;  %v667_v4 = vpack.c.bf16 %v256_v2, %v254_v1  ;;  %v255_v5 = vld [vmem:[#allocation5 + $0x10] sm:$0xff]  ;;  %v258_v6 = vld [vmem:[#allocation5 + $0x28] sm:$0xff]  ;;  %s234_s23 = scalar_lea.vmem [#allocation7], %s647_s21  ;;  %s1182_s6 = scalar_lea.hbm %s1305_s2, %s664_s28 }
  0x5a   : > { %v260_v7 = vld [vmem:[#allocation5 + $0x38] sm:$0xff]  ;;  %v669_v8 = vpack.c.bf16 %v255_v5, %v253_v3  ;;  %v257_v10 = vld [vmem:[#allocation5 + $0x20] sm:$0xff]  ;;  %v259_v11 = vld [vmem:[#allocation5 + $0x30] sm:$0xff]  ;;  %s465_s10 = sshll.u32 %s234_s23, 4  ;;  %s441_s26 = scalar_lea.sflag [#allocation4], %s1159_s14  ;;  %s1177_s10 = int_to_ptr.vmem [resolvable:$true] %s465_s10 }
  0x5b   : > { %v671_v9 = vpack.c.bf16 %v260_v7, %v258_v6  ;;  %v262_v12 = vld [vmem:[#allocation5 + $0x48] sm:$0xff]  ;;  %668 = vmatprep.subr.bf16.mxu0 %v667_v4  ;;  %699 = vmatprep.subr.bf16.mxu1 %v667_v4  ;;  %v264_v13 = vld [vmem:[#allocation5 + $0x58] sm:$0xff]  ;;  %v673_v14 = vpack.c.bf16 %v259_v11, %v257_v10  ;;  %v261_v16 = vld [vmem:[#allocation5 + $0x40] sm:$0xff]  ;;  %s848_s9 = scalar_lea.vmem %s1177_s10, 512  ;;  %s987_s25 = smov [#allocation7]  }
  0x5c   : > { %670 = vmatpush1.bf16.msra.mxu0 %v669_v8  ;;  %707 = vmatpush1.bf16.msra.mxu1 %v669_v8  ;;  %v675_v15 = vpack.c.bf16 %v264_v13, %v262_v12  ;;  %v263_v17 = vld [vmem:[#allocation5 + $0x50] sm:$0xff]  ;;  %v266_v18 = vld [vmem:[#allocation5 + $0x68] sm:$0xff]  ;;  %v268_v19 = vld [vmem:[#allocation5 + $0x78] sm:$0xff]  ;;  %p849_p4 = scmp.ne.s32.totalorder %s1177_s10, %s848_s9  ;;  %s852_s12 = sshll.u32 %s987_s25, 4  ;;  %s853_s12 = int_to_ptr.vmem [resolvable:$false] %s852_s12 }
  0x5d   : > { %672 = vmatprep.subr.bf16.mxu0 %v671_v9  ;;  %700 = vmatprep.subr.bf16.mxu1 %v671_v9  ;;  %v677_v20 = vpack.c.bf16 %v263_v17, %v261_v16  ;;  %v679_v21 = vpack.c.bf16 %v268_v19, %v266_v18  ;;  %v265_v22 = vld [vmem:[#allocation5 + $0x60] sm:$0xff]  ;;  %v267_v23 = vld [vmem:[#allocation5 + $0x70] sm:$0xff]  ;;  %v270_v24 = vld [vmem:[#allocation5 + $0x88] sm:$0xff]  ;;  %s854_s13 = scalar_lea.vmem %s853_s12, 1024  ;;  %p855_p10 = scmp.lt.s32.totalorder %s1177_s10, %s853_s12 }
  0x5e   : > { %v272_v25 = vld [vmem:[#allocation5 + $0x98] sm:$0xff]  ;;  %v681_v26 = vpack.c.bf16 %v267_v23, %v265_v22  ;;  %v269_v28 = vld [vmem:[#allocation5 + $0x80] sm:$0xff]  ;;  %v271_v29 = vld [vmem:[#allocation5 + $0x90] sm:$0xff]  ;;  %p850_p6 = pnand %p849_p4, %p1111_p12  ;;  %p856_p13 = scmp.lt.s32.totalorder %s854_s13, %s848_s9 }
  0x5f   : > { %v683_v27 = vpack.c.bf16 %v272_v25, %v270_v24  ;;  %v274_v30 = vld [vmem:[#allocation5 + $0xa8] sm:$0xff]  ;;  %v276_v31 = vld [vmem:[#allocation5 + $0xb8] sm:$0xff]  ;;  %v685_v32 = vpack.c.bf16 %v271_v29, %v269_v28  ;;  %v273_v34 = vld [vmem:[#allocation5 + $0xa0] sm:$0xff] }
  0x60   : > { %674 = vmatpush1.bf16.msra.mxu0 %v673_v14  ;;  %708 = vmatpush1.bf16.msra.mxu1 %v673_v14  ;;  %v687_v33 = vpack.c.bf16 %v276_v31, %v274_v30  ;;  %v275_v35 = vld [vmem:[#allocation5 + $0xb0] sm:$0xff]  ;;  %v278_v36 = vld [vmem:[#allocation5 + $0xc8] sm:$0xff]  ;;  %v280_v37 = vld [vmem:[#allocation5 + $0xd8] sm:$0xff]  ;;  %p851_p8 = pneg %p850_p6  ;;  %p857_p3 = por %p856_p13, %p855_p10 }
  0x61   : > { %676 = vmatprep.subr.bf16.mxu0 %v675_v15  ;;  %701 = vmatprep.subr.bf16.mxu1 %v675_v15  ;;  %v689_v38 = vpack.c.bf16 %v275_v35, %v273_v34  ;;  %v691_v39 = vpack.c.bf16 %v280_v37, %v278_v36  ;;  %v277_v40 = vld [vmem:[#allocation5 + $0xc0] sm:$0xff]  ;;  %v279_v41 = vld [vmem:[#allocation5 + $0xd0] sm:$0xff]  ;;  %v282_v42 = vld [vmem:[#allocation5 + $0xe8] sm:$0xff] }
  0x62   : > { %v284_v43 = vld [vmem:[#allocation5 + $0xf8] sm:$0xff]  ;;  %v693_v44 = vpack.c.bf16 %v279_v41, %v277_v40  ;;  %v281_v46 = vld [vmem:[#allocation5 + $0xe0] sm:$0xff]  ;;  %v283_v47 = vld [vmem:[#allocation5 + $0xf0] sm:$0xff]  ;;  %p858_p7 = pnand %p857_p3, %p851_p8 }
  0x63   : > { %v695_v45 = vpack.c.bf16 %v284_v43, %v282_v42  ;;  %v697_v48 = vpack.c.bf16 %v283_v47, %v281_v46  ;;  %v251_v49 = vld [vmem:[%s1163_s8] sm:$0xff]  ;;  %v252_v50 = vld [vmem:[%s1163_s8 + $0x8] sm:$0xff] }
  0x64   : > { %678 = vmatpush1.bf16.msra.mxu0 %v677_v20  ;;  %709 = vmatpush1.bf16.msra.mxu1 %v677_v20 }
  0x65   : > { %680 = vmatprep.subr.bf16.mxu0 %v679_v21  ;;  %702 = vmatprep.subr.bf16.mxu1 %v679_v21 }
  0x68   : > { %682 = vmatpush1.bf16.msra.mxu0 %v681_v26  ;;  %710 = vmatpush1.bf16.msra.mxu1 %v681_v26 }
  0x69   : > { %684 = vmatprep.subr.bf16.mxu0 %v683_v27  ;;  %703 = vmatprep.subr.bf16.mxu1 %v683_v27 }
  0x6c   : > { %686 = vmatpush1.bf16.msra.mxu0 %v685_v32  ;;  %711 = vmatpush1.bf16.msra.mxu1 %v685_v32 }
  0x6d   : > { %688 = vmatprep.subr.bf16.mxu0 %v687_v33  ;;  %704 = vmatprep.subr.bf16.mxu1 %v687_v33 }
  0x70   : > { %690 = vmatpush1.bf16.msra.mxu0 %v689_v38  ;;  %712 = vmatpush1.bf16.msra.mxu1 %v689_v38 }
  0x71   : > { %692 = vmatprep.subr.bf16.mxu0 %v691_v39  ;;  %705 = vmatprep.subr.bf16.mxu1 %v691_v39 }
  0x74   : > { %694 = vmatpush1.bf16.msra.mxu0 %v693_v44  ;;  %713 = vmatpush1.bf16.msra.mxu1 %v693_v44 }
  0x75   : > { %696 = vmatprep.subr.bf16.mxu0 %v695_v45  ;;  %706 = vmatprep.subr.bf16.mxu1 %v695_v45 }
  0x78   : > { %698 = vmatpush1.bf16.msra.mxu0 %v697_v48  ;;  %714 = vmatpush1.bf16.msra.mxu1 %v697_v48 }
  0x7b   : > { %350 = vmatmul.mubr.f32.vlgmr.msra.gmra.mrb[0].mxu0 %v251_v49  ;;  %356 = vmatmul.mubr.f32.vlgmr.msra.gmra.mrb[0].mxu1 %v252_v50 }
 0x14e   : > { %v351_v51 = vpop.f32.mrb[0].mxu0  ;;  %v357_v52 = vpop.f32.mrb[0].mxu1 }
 0x14f   : > { %362 = vst [vmem:[%s234_s23] sm:$0xff] %v351_v51  ;;  %v403_v53 = vmul.f32 %v351_v51, %v351_v51  ;;  %364 = vst [vmem:[%s234_s23 + $0x10] sm:$0xff] %v357_v52  ;;  %v366_v54 = vadd.f32 %v357_v52, %v351_v51  ;;  %v405_v55 = vmul.f32 %v357_v52, %v357_v52  ;;  %v353_v56 = vpop.f32.mrb[1].mxu0  ;;  %v359_v57 = vpop.f32.mrb[1].mxu1 }
 0x150   : > { %363 = vst [vmem:[%s234_s23 + $0x8] sm:$0xff] %v353_v56  ;;  %v404_v58 = vmul.f32 %v353_v56, %v353_v56  ;;  %365 = vst [vmem:[%s234_s23 + $0x18] sm:$0xff] %v359_v57  ;;  %v373_v59 = vadd.f32 %v359_v57, %v353_v56  ;;  %v406_v60 = vmul.f32 %v359_v57, %v359_v57 }
 0x151   : > { %v367_v61 = vrot.slane %v366_v54, 4  ;;  %v407_v62 = vadd.f32 %v405_v55, %v403_v53 }
 0x152   : > { %861 = shalt.err (!%p858_p7)
}
 0x153   : > { %s862_s24 = scalar_lea.hbm %s1182_s6, 512  ;;  %s866_s21 = scalar_lea.hbm %s1305_s2, 1024 }
 0x154   : > { %p863_p9 = scmp.ne.s32.totalorder %s1182_s6, %s862_s24  ;;  %p867_p5 = scmp.lt.u32.totalorder %s1182_s6, %s1305_s2 }
 0x155   : > { %p868_p11 = scmp.lt.u32.totalorder %s866_s21, %s862_s24  ;;  %p870_p4 = scmp.lt.u32.totalorder %s862_s24, %s1182_s6 }
 0x156   : > { %p864_p2 = pnand %p863_p9, %p1111_p12 }
 0x157   : > { %p869_p1 = por %p868_p11, %p867_p5 }
 0x158   : > { %p865_p0 = pneg %p864_p2 }
 0x159   : > { %p871_p6 = por %p870_p4, %p869_p1 }
 0x15b   : > { %p872_p8 = pnand %p871_p6, %p865_p0 }
 0x15d   : > { %875 = shalt.err (!%p872_p8)
}
 0x15e   : > { %s988_s29 = smov 256   ;;  %s989_s11 = smov 16   ;;  %v374_v63 = vrot.slane %v373_v59, 4  ;;  %v414_v0 = vadd.f32 %v406_v60, %v404_v58  ;;  %v368_v1 = vadd.f32 %v367_v61, %v366_v54  ;;  %v408_v2 = vrot.slane %v407_v62, 4 }
 0x15f   : > { %721 = dma.vmem_to_hbm [thread:$0]  (%p1111_p12), %s1177_s10, 512, %s1182_s6, %s441_s26, %s988_s29, %s988_s29, %s989_s11   ;;  %v990_v4 = vmov 1966171168   ;;  %v386_v6 = vlaneseq }
 0x160   : > { %v375_v3 = vadd.f32 %v374_v63, %v373_v59  ;;  %v384_v5 = vunpack.c.l.s4 %v990_v4  ;;  %v415_v7 = vrot.slane %v414_v0, 4  ;;  %v369_v8 = vrot.slane %v368_v1, 2  ;;  %s648_s10 = sshll.u32 %s1159_s14, 1  ;;  %s445_s6 = sand.u32 1, %s1039_s19  }
 0x161   : > { %v409_v9 = vadd.f32 %v408_v2, %v407_v62  ;;  %v387_v16 = vshrl.u32 %v386_v6, 7  ;;  %s665_s26 = sshll.u32 %s1039_s19, 5  ;;  %s241_s9 = scalar_lea.vmem [#allocation8], %s648_s10  ;;  %vm1211_vm0 = vcmp.lt.s32.totalorder %v386_v6, 256 }
 0x162   : > { %v376_v10 = vrot.slane %v375_v3, 2  ;;  %v416_v11 = vadd.f32 %v415_v7, %v414_v0  ;;  %v370_v12 = vadd.f32 %v369_v8, %v368_v1  ;;  %v385_v15 = vunpack.c.0.s8 %v384_v5  ;;  %s482_s25 = sshll.u32 %s241_s9, 4  ;;  %s1215_s14 = scalar_lea.vmem [#allocation10], %s648_s10  ;;  %s1223_s25 = int_to_ptr.vmem [resolvable:$true] %s482_s25 }
 0x163   : > { %v410_v13 = vrot.slane %v409_v9, 2  ;;  %s496_s12 = sshll.u32 %s1215_s14, 4  ;;  %s1221_s7 = scalar_lea.hbm %s1306_s3, %s665_s26  ;;  %s1232_s12 = int_to_ptr.vmem [resolvable:$true] %s496_s12 }
 0x164   : > { %v377_v14 = vadd.f32 %v376_v10, %v375_v3  ;;  %v417_v17 = vrot.slane %v416_v11, 2  ;;  %v371_v18 = vrot.slane %v370_v12, 1  ;;  %v388_v25 = vsub.s32 %v385_v15, %v387_v16  ;;  %s1230_s21 = scalar_lea.hbm %s1307_s4, %s665_s26  ;;  %s1234_s23 = scalar_lea.sflag [#allocation9], %s445_s6 }
 0x165   : > { %v411_v19 = vadd.f32 %v410_v13, %v409_v9  ;;  %s876_s28 = scalar_lea.vmem %s1223_s25, 32  ;;  %s991_s29 = smov [#allocation8]  }
 0x166   : > { %v378_v20 = vrot.slane %v377_v14, 1  ;;  %v418_v21 = vadd.f32 %v417_v17, %v416_v11  ;;  %v372_v22 = vadd.f32 %v371_v18, %v370_v12  ;;  %p877_p10 = scmp.ne.s32.totalorder %s1223_s25, %s876_s28  ;;  %s880_s11 = sshll.u32 %s991_s29, 4  ;;  %s881_s11 = int_to_ptr.vmem [resolvable:$false] %s880_s11 }
 0x167   : > { %v412_v23 = vrot.slane %v411_v19, 1  ;;  %s882_s10 = scalar_lea.vmem %s881_s11, 64  ;;  %p883_p7 = scmp.lt.s32.totalorder %s1223_s25, %s881_s11 }
 0x168   : > { %v379_v24 = vadd.f32 %v378_v20, %v377_v14  ;;  %v419_v26 = vrot.slane %v418_v21, 1  ;;  %p878_p13 = pnand %p877_p10, %p1111_p12  ;;  %p884_p9 = scmp.lt.s32.totalorder %s882_s10, %s876_s28 }
 0x169   : > { %v413_v27 = vadd.f32 %v412_v23, %v411_v19 }
 0x16a   : > { %v382_v28 = vcombine.low %v372_v22, %v379_v24  ;;  %v420_v29 = vadd.f32 %v419_v26, %v418_v21  ;;  %p879_p3 = pneg %p878_p13  ;;  %p885_p2 = por %p884_p9, %p883_p7 }
 0x16c   : > { %v389_v30 = vrot.slane %v382_v28, %v388_v25  ;;  %v423_v31 = vcombine.low %v413_v27, %v420_v29  ;;  %p886_p0 = pnand %p885_p2, %p879_p3 }
 0x16e   : > { %v430_v33 = vrot.slane %v423_v31, %v388_v25  ;;  %v396_v34 = vrot.slane %v389_v30, %v388_v25 }
 0x170   : > { %v437_v35 = vrot.slane %v430_v33, %v388_v25  ;;  %402 = vst.msk [vmem:[%s241_s9] sm:$0x3] %vm1211_vm0, %v396_v34 }
 0x171   : > { %889 = shalt.err (!%p886_p0)
}
 0x172   : > { %s890_s6 = scalar_lea.hbm %s1221_s7, 32  ;;  %s894_s13 = scalar_lea.hbm %s1306_s3, 64 }
 0x173   : > { %p891_p5 = scmp.ne.s32.totalorder %s1221_s7, %s890_s6  ;;  %p895_p4 = scmp.lt.u32.totalorder %s1221_s7, %s1306_s3 }
 0x174   : > { %p896_p6 = scmp.lt.u32.totalorder %s894_s13, %s890_s6  ;;  %p898_p10 = scmp.lt.u32.totalorder %s890_s6, %s1221_s7 }
 0x175   : > { %p892_p11 = pnand %p891_p5, %p1111_p12 }
 0x176   : > { %p897_p8 = por %p896_p6, %p895_p4 }
 0x177   : > { %p893_p1 = pneg %p892_p11 }
 0x178   : > { %p899_p13 = por %p898_p10, %p897_p8 }
 0x17a   : > { %p900_p3 = pnand %p899_p13, %p893_p1 }
 0x17c   : > { %903 = shalt.err (!%p900_p3)
}
 0x17d   : > { %722 = dma.vmem_to_hbm [thread:$0]  (%p1111_p12), %s1223_s25, 32, %s1221_s7, %s1234_s23   ;;  %439 = vst.msk [vmem:[%s1215_s14] sm:$0x3] %vm1211_vm0, %v437_v35 }
 0x17e   : > { %s904_s8 = scalar_lea.vmem %s1232_s12, 32  ;;  %s992_s28 = smov [#allocation10]  }
 0x17f   : > { %p905_p7 = scmp.ne.s32.totalorder %s1232_s12, %s904_s8  ;;  %s908_s29 = sshll.u32 %s992_s28, 4  ;;  %s909_s29 = int_to_ptr.vmem [resolvable:$false] %s908_s29 }
 0x180   : > { %s910_s11 = scalar_lea.vmem %s909_s29, 64  ;;  %p911_p0 = scmp.lt.s32.totalorder %s1232_s12, %s909_s29 }
 0x181   : > { %p906_p9 = pnand %p905_p7, %p1111_p12  ;;  %p912_p5 = scmp.lt.s32.totalorder %s910_s11, %s904_s8 }
 0x183   : > { %p907_p2 = pneg %p906_p9  ;;  %p913_p11 = por %p912_p5, %p911_p0 }
 0x185   : > { %p914_p1 = pnand %p913_p11, %p907_p2 }
 0x187   : > { %917 = shalt.err (!%p914_p1)
}
 0x188   : > { %s918_s25 = scalar_lea.hbm %s1230_s21, 32  ;;  %s922_s10 = scalar_lea.hbm %s1307_s4, 64 }
 0x189   : > { %p919_p4 = scmp.ne.s32.totalorder %s1230_s21, %s918_s25  ;;  %p923_p10 = scmp.lt.u32.totalorder %s1230_s21, %s1307_s4 }
 0x18a   : > { %p924_p13 = scmp.lt.u32.totalorder %s922_s10, %s918_s25  ;;  %p926_p7 = scmp.lt.u32.totalorder %s918_s25, %s1230_s21 }
 0x18b   : > { %p920_p6 = pnand %p919_p4, %p1111_p12 }
 0x18c   : > { %p925_p3 = por %p924_p13, %p923_p10 }
 0x18d   : > { %p921_p8 = pneg %p920_p6 }
 0x18e   : > { %p927_p9 = por %p926_p7, %p925_p3 }
 0x190   : > { %p928_p2 = pnand %p927_p9, %p921_p8 }
 0x192   : > { %931 = shalt.err (!%p928_p2)
}
 0x193   : > { %723 = dma.vmem_to_hbm [thread:$0]  (%p1111_p12), %s1232_s12, 32, %s1230_s21, %s1234_s23  }
 0x194 PF: > { %s508_s9 = sand.u32 1, %s966_s15   ;;  %p1324_p0 = scmp.ne.s32.totalorder %s1312_s22, 0 }
 0x195   : > { %p1325_p5 = scmp.ge.s32.totalorder %s978_s18, 2  ;;  %s509_s13 = scalar_lea.sflag [#allocation4], %s508_s9 }
 0x197   : > { %p736_p11 = pnand %p1325_p5, %p1324_p0 }
 0x199   : > { %957 = dma.done.wait (!%p736_p11), %s509_s13, 512  }
 0x19a   : > { %959 = vsyncadd (!%p736_p11), %s509_s13, 4294966784  ;;  %s517_s24 = sand.u32 1, %s637_s20  }
 0x19b   : > { %s518_s19 = scalar_lea.sflag [#allocation9], %s517_s24 }
 0x19c   : > { %961 = dma.done.wait (!%p736_p11), %s518_s19, 64  }
 0x19d   : > { %963 = vsyncadd (!%p736_p11), %s518_s19, 4294967232  ;;  %p22_p12 = scmp.ge.s32.totalorder %s1076_s27, 4   ;;  %s1326_s15 = smov %s970_s16 }
 0x19e   : > { %s1327_s16 = smov %s974_s17  ;;  %s1328_s17 = smov %s1107_s30 }
 0x19f   : > { %s1329_s18 = smov %s1076_s27  ;;  %24 = sbr.rel (!%p22_p12) target bundleno = 8 (0x8), region = 109 }
 0x1a6   :  { %532 = vsyncpa [#allocation3], 1 }
 0x1a7   :  { %534 = vsyncpa [#allocation3 + $0x1], 1 }
 0x1a8   :  { %535 = vsyncpa [#allocation6], 1 }
 0x1a9   :  { %536 = vsyncpa [#allocation4], 1 }
 0x1aa   :  { %538 = vsyncpa [#allocation4 + $0x1], 1 }
 0x1ab   :  { %539 = vsyncpa [#allocation9], 1 }
 0x1ac   :  { %541 = vsyncpa [#allocation9 + $0x1], 1 }

</bundles_post_ra>
